<compile_context>
chip_gen: v5e
topology: v5e:2x2
jax: 0.10.0
libtpu: 0.0.40
codegen_flags: <defaults>
</compile_context>

<pallas_src>
import functools

import jax
import jax.numpy as jnp
from jax.experimental import pallas as pl
from jax.experimental.pallas import tpu as pltpu


def cfm_kernel(*refs, bblk, sigma, has_eps, matmul_dtype):
    """One grid step == `bblk` batch elements, channel-on-sublane layout.

    t_ref               : (Bblk, 1)      SMEM
    x0/x1[/eps] refs    : (Bblk, C, HW)  VMEM
    w1t (hid, C), b1 (hid, 1), w2t (C, hid), b2 (C, 1), wt/bt (hid, 1) : VMEM
    xt/ut refs          : (Bblk, C, HW)  VMEM outputs
    loss_ref            : (1, 1)         SMEM per-block sum of squared error
    """
    if has_eps:
        (t_ref, x0_ref, x1_ref, eps_ref,
         w1t_ref, b1_ref, w2t_ref, b2_ref, wt_ref, bt_ref,
         xt_ref, ut_ref, loss_ref) = refs
    else:
        (t_ref, x0_ref, x1_ref,
         w1t_ref, b1_ref, w2t_ref, b2_ref, wt_ref, bt_ref,
         xt_ref, ut_ref, loss_ref) = refs
        eps_ref = None

    # Load & cast weights once per grid step (hoisted out of the unrolled batch loop).
    w1t = w1t_ref[...].astype(matmul_dtype)        # (hidden, C)
    w2t = w2t_ref[...].astype(matmul_dtype)        # (C, hidden)
    b1 = b1_ref[...]                               # (hidden, 1)
    b2 = b2_ref[...]                               # (C, 1)
    wt = wt_ref[...]                               # (hidden, 1)
    bt = bt_ref[...]                               # (hidden, 1)

    sse = jnp.float32(0.0)
    for b in range(bblk):                          # static unroll, bblk <= 8
        tb = t_ref[b, 0]                           # scalar time level
        x0b = x0_ref[b]                            # (C, HW)
        x1b = x1_ref[b]

        # sample_xt: mu_t + sigma_t * eps   (mu_t = t*x1 + (1-t)*x0, sigma_t = sigma)
        xtb = tb * x1b + (1.0 - tb) * x0b
        if has_eps:
            xtb = xtb + sigma * eps_ref[b]
        # conditional flow ut(x1|x0) = x1 - x0
        utb = x1b - x0b
        xt_ref[b] = xtb
        ut_ref[b] = utb

        # --- synthetic stand-in UNet: per-pixel MLP with SiLU time conditioning ---
        temb = tb * wt + bt                        # (hidden, 1)
        temb = temb * jax.nn.sigmoid(temb)         # silu
        bias = b1 + temb                           # hoisted single (hidden, 1) add
        h = jnp.dot(w1t, xtb.astype(matmul_dtype),
                    preferred_element_type=jnp.float32)          # (hidden, HW)
        h = h + bias
        h = h * jax.nn.sigmoid(h)                  # silu
        vt = jnp.dot(w2t, h.astype(matmul_dtype),
                     preferred_element_type=jnp.float32) + b2    # (C, HW)

        diff = vt - utb
        sse = sse + jnp.sum(diff * diff)

    loss_ref[0, 0] = sse


def _pick_bblk(bs, per_elem_bytes, n_streams,
               budget_bytes=24 * 1024 * 1024, max_unroll=8):
    """Largest divisor of bs s.t. double-buffered streamed blocks fit the VMEM budget."""
    cap = max(1, budget_bytes // (2 * n_streams * per_elem_bytes))
    cap = int(min(cap, max_unroll, bs))
    bblk = 1
    for d in range(1, cap + 1):
        if bs % d == 0:
            bblk = d
    return bblk


def conditional_flow_matcher_forward(data, x0, t, params, *, eps=None,
                                     sigma=0.0, weight_scale=1.0,
                                     matmul_dtype=jnp.bfloat16):
    """data/x0[/eps]: (bs, C, H, W) f32 (NCHW, like PyTorch);  t: (bs,) f32."""
    bs, C, H, W = data.shape
    HW = H * W
    hidden = params["w1"].shape[1]
    has_eps = (float(sigma) != 0.0)
    if has_eps and eps is None:
        raise ValueError("eps must be provided when sigma != 0")

    # Free (no-transpose) NCHW -> (bs, C, HW): channels on sublanes, HW on lanes.
    x0r = x0.reshape(bs, C, HW)
    x1r = data.reshape(bs, C, HW)
    t2 = t.reshape(bs, 1).astype(jnp.float32)

    # Tiny weights re-laid-out once for the (C-on-sublane) kernel.
    w1t = jnp.asarray(params["w1"]).T.reshape(hidden, C)
    b1c = jnp.asarray(params["b1"]).reshape(hidden, 1)
    w2t = jnp.asarray(params["w2"]).T.reshape(C, hidden)
    b2c = jnp.asarray(params["b2"]).reshape(C, 1)
    wtc = jnp.asarray(params["wt"]).reshape(hidden, 1)
    btc = jnp.asarray(params["bt"]).reshape(hidden, 1)

    n_streams = 4 + (1 if has_eps else 0)          # x0, x1, (eps), xt, ut
    per_elem_bytes = C * HW * 4
    bblk = _pick_bblk(bs, per_elem_bytes, n_streams)
    grid = (bs // bblk,)

    # Explicit VMEM budget: double-buffered streams + weights, capped for v7x (64 MiB).
    block_bytes = bblk * per_elem_bytes
    weight_bytes = 4 * (2 * hidden * C + 4 * hidden + C)
    vmem_needed = 2 * n_streams * block_bytes + weight_bytes + 2 * 1024 * 1024
    vmem_limit = int(min(max(vmem_needed, 16 * 1024 * 1024), 48 * 1024 * 1024))

    stream_spec = pl.BlockSpec((bblk, C, HW), lambda g: (g, 0, 0))
    full2d = lambda shp: pl.BlockSpec(shp, lambda g: (0, 0))

    in_specs = [
        pl.BlockSpec((bblk, 1), lambda g: (g, 0), memory_space=pltpu.SMEM),  # t
        stream_spec,                                                         # x0
        stream_spec,                                                         # x1 (=data)
    ]
    in_args = [t2, x0r, x1r]
    if has_eps:
        in_specs.append(stream_spec)                                         # eps
        in_args.append(eps.reshape(bs, C, HW))
    in_specs += [full2d((hidden, C)), full2d((hidden, 1)),
                 full2d((C, hidden)), full2d((C, 1)),
                 full2d((hidden, 1)), full2d((hidden, 1))]
    in_args += [w1t, b1c, w2t, b2c, wtc, btc]

    kern = functools.partial(cfm_kernel, bblk=bblk, sigma=float(sigma),
                             has_eps=has_eps, matmul_dtype=matmul_dtype)

    xt, ut, sse = pl.pallas_call(
        kern,
        grid=grid,
        in_specs=in_specs,
        out_specs=(
            stream_spec,                                                     # xt
            stream_spec,                                                     # ut
            pl.BlockSpec((1, 1), lambda g: (g, 0), memory_space=pltpu.SMEM), # per-block SSE
        ),
        out_shape=(
            jax.ShapeDtypeStruct((bs, C, HW), jnp.float32),
            jax.ShapeDtypeStruct((bs, C, HW), jnp.float32),
            jax.ShapeDtypeStruct((grid[0], 1), jnp.float32),
        ),
        compiler_params=pltpu.CompilerParams(
            dimension_semantics=("parallel",),        # batch blocks are independent
            vmem_limit_bytes=vmem_limit),
    )(*in_args)

    loss = jnp.sum(sse) / (bs * C * HW) * weight_scale
    log_vars = dict(loss_ddpm_mse=loss)
    return loss, log_vars, t, xt.reshape(bs, C, H, W), ut.reshape(bs, C, H, W)


def _reference(data, x0, eps, t, params, sigma, weight_scale):
    """Pure-JAX reference of the same forward pass (f32 everywhere)."""
    bs, C, H, W = data.shape
    tpad = t.reshape(bs, 1, 1, 1)
    xt = tpad * data + (1.0 - tpad) * x0 + sigma * eps
    ut = data - x0
    xcl = jnp.transpose(xt, (0, 2, 3, 1)).reshape(bs, H * W, C)
    ucl = jnp.transpose(ut, (0, 2, 3, 1)).reshape(bs, H * W, C)
    temb = jax.nn.silu(t[:, None, None] * params["wt"][None, None, :]
                       + params["bt"][None, None, :])                 # (bs, 1, hidden)
    h = jax.nn.silu(xcl @ params["w1"] + params["b1"][None, None, :] + temb)
    vt = h @ params["w2"] + params["b2"][None, None, :]
    loss = jnp.mean((vt - ucl) ** 2) * weight_scale
    return loss, xt, ut


if __name__ == "__main__":
    bs, C, H, W = 2, 4, 16, 16
    hidden = 32
    weight_scale = 1.0

    key = jax.random.PRNGKey(0)
    kd, k0, ke, kt, kw = jax.random.split(key, 5)

    # `data` plays the role of x1; x0/eps are the module's randn_like draws.
    data = jax.random.normal(kd, (bs, C, H, W), jnp.float32)
    x0 = jax.random.normal(k0, (bs, C, H, W), jnp.float32)
    eps = jax.random.normal(ke, (bs, C, H, W), jnp.float32)
    t = jax.random.uniform(kt, (bs,), jnp.float32)

    ks = jax.random.split(kw, 3)
    params = dict(
        w1=0.1 * jax.random.normal(ks[0], (C, hidden), jnp.float32),
        b1=jnp.zeros((hidden,), jnp.float32),
        w2=0.1 * jax.random.normal(ks[1], (hidden, C), jnp.float32),
        b2=jnp.zeros((C,), jnp.float32),
        wt=0.1 * jax.random.normal(ks[2], (hidden,), jnp.float32),
        bt=jnp.zeros((hidden,), jnp.float32),
    )

    # --- sigma = 0 (module default): eps stream is statically skipped in the kernel ---
    sigma = 0.0
    loss, log_vars, t_out, xt, ut = conditional_flow_matcher_forward(
        data, x0, t, params, eps=None, sigma=sigma, weight_scale=weight_scale)
    jax.block_until_ready((loss, xt, ut))

    ref_loss, ref_xt, ref_ut = _reference(
        data, x0, jnp.zeros_like(data), t, params, sigma, weight_scale)
    assert jnp.allclose(xt, ref_xt, rtol=1e-5, atol=1e-5)
    assert jnp.allclose(ut, ref_ut, rtol=1e-5, atol=1e-5)
    # bf16 matmul operands inside the synthetic UNet -> slightly looser loss tolerance.
    assert jnp.allclose(loss, ref_loss, rtol=2e-2, atol=1e-3), (loss, ref_loss)

    # --- sigma != 0 path (exercises the eps stream) ---
    sigma2 = 0.3
    loss2, _, _, xt2, ut2 = conditional_flow_matcher_forward(
        data, x0, t, params, eps=eps, sigma=sigma2, weight_scale=weight_scale)
    jax.block_until_ready((loss2, xt2, ut2))
    ref_loss2, ref_xt2, ref_ut2 = _reference(data, x0, eps, t, params, sigma2, weight_scale)
    assert jnp.allclose(xt2, ref_xt2, rtol=1e-5, atol=1e-5)
    assert jnp.allclose(ut2, ref_ut2, rtol=1e-5, atol=1e-5)
    assert jnp.allclose(loss2, ref_loss2, rtol=2e-2, atol=1e-3), (loss2, ref_loss2)

    print("KERNEL_OK")
</pallas_src>

<mosaic_0001>
module attributes {stable_mosaic.version = 11 : i64} {
  func.func @cfm_kernel(%arg0: i32, %arg1: memref<2x1xf32, #tpu.memory_space<smem>>, %arg2: memref<2x4x256xf32, #tpu.memory_space<vmem>>, %arg3: memref<2x4x256xf32, #tpu.memory_space<vmem>>, %arg4: memref<32x4xf32, #tpu.memory_space<vmem>>, %arg5: memref<32x1xf32, #tpu.memory_space<vmem>>, %arg6: memref<4x32xf32, #tpu.memory_space<vmem>>, %arg7: memref<4x1xf32, #tpu.memory_space<vmem>>, %arg8: memref<32x1xf32, #tpu.memory_space<vmem>>, %arg9: memref<32x1xf32, #tpu.memory_space<vmem>>, %arg10: memref<2x4x256xf32, #tpu.memory_space<vmem>>, %arg11: memref<2x4x256xf32, #tpu.memory_space<vmem>>, %arg12: memref<1x1xf32, #tpu.memory_space<smem>>) attributes {dimension_semantics = [#tpu.dimension_semantics<parallel>], iteration_bounds = array<i64: 1>, scalar_prefetch = 0 : i64, scratch_operands = 0 : i64, tpu.core_type = #tpu.core_type<tc>, window_params = [{transform_indices = @transform_0, window_bounds = array<i64: 2, 1>}, {transform_indices = @transform_1, window_bounds = array<i64: 2, 4, 256>}, {transform_indices = @transform_2, window_bounds = array<i64: 2, 4, 256>}, {pipeline_mode = #tpu.pipeline_mode<synchronous>, transform_indices = @transform_3, window_bounds = array<i64: 32, 4>}, {pipeline_mode = #tpu.pipeline_mode<synchronous>, transform_indices = @transform_4, window_bounds = array<i64: 32, 1>}, {pipeline_mode = #tpu.pipeline_mode<synchronous>, transform_indices = @transform_5, window_bounds = array<i64: 4, 32>}, {pipeline_mode = #tpu.pipeline_mode<synchronous>, transform_indices = @transform_6, window_bounds = array<i64: 4, 1>}, {pipeline_mode = #tpu.pipeline_mode<synchronous>, transform_indices = @transform_7, window_bounds = array<i64: 32, 1>}, {pipeline_mode = #tpu.pipeline_mode<synchronous>, transform_indices = @transform_8, window_bounds = array<i64: 32, 1>}, {transform_indices = @transform_9, window_bounds = array<i64: 2, 4, 256>}, {transform_indices = @transform_10, window_bounds = array<i64: 2, 4, 256>}, {transform_indices = @transform_11, window_bounds = array<i64: 1, 1>}]} {
    %c0 = arith.constant 0 : index
    %c0_0 = arith.constant 0 : index
    %0 = vector.load %arg4[%c0, %c0_0] : memref<32x4xf32, #tpu.memory_space<vmem>>, vector<32x4xf32>
    %1 = arith.truncf %0 : vector<32x4xf32> to vector<32x4xbf16>
    %c0_1 = arith.constant 0 : index
    %c0_2 = arith.constant 0 : index
    %2 = vector.load %arg6[%c0_1, %c0_2] : memref<4x32xf32, #tpu.memory_space<vmem>>, vector<4x32xf32>
    %3 = arith.truncf %2 : vector<4x32xf32> to vector<4x32xbf16>
    %c0_3 = arith.constant 0 : index
    %c0_4 = arith.constant 0 : index
    %4 = vector.load %arg5[%c0_3, %c0_4] : memref<32x1xf32, #tpu.memory_space<vmem>>, vector<32x1xf32>
    %c0_5 = arith.constant 0 : index
    %c0_6 = arith.constant 0 : index
    %5 = vector.load %arg7[%c0_5, %c0_6] : memref<4x1xf32, #tpu.memory_space<vmem>>, vector<4x1xf32>
    %c0_7 = arith.constant 0 : index
    %c0_8 = arith.constant 0 : index
    %6 = vector.load %arg8[%c0_7, %c0_8] : memref<32x1xf32, #tpu.memory_space<vmem>>, vector<32x1xf32>
    %c0_9 = arith.constant 0 : index
    %c0_10 = arith.constant 0 : index
    %7 = vector.load %arg9[%c0_9, %c0_10] : memref<32x1xf32, #tpu.memory_space<vmem>>, vector<32x1xf32>
    %c0_11 = arith.constant 0 : index
    %c0_12 = arith.constant 0 : index
    %8 = memref.load %arg1[%c0_11, %c0_12] : memref<2x1xf32, #tpu.memory_space<smem>>
    %c0_13 = arith.constant 0 : index
    %c0_14 = arith.constant 0 : index
    %c0_15 = arith.constant 0 : index
    %9 = vector.load %arg2[%c0_13, %c0_14, %c0_15] : memref<2x4x256xf32, #tpu.memory_space<vmem>>, vector<1x4x256xf32>
    %10 = vector.shape_cast %9 : vector<1x4x256xf32> to vector<4x256xf32>
    %c0_16 = arith.constant 0 : index
    %c0_17 = arith.constant 0 : index
    %c0_18 = arith.constant 0 : index
    %11 = vector.load %arg3[%c0_16, %c0_17, %c0_18] : memref<2x4x256xf32, #tpu.memory_space<vmem>>, vector<1x4x256xf32>
    %12 = vector.shape_cast %11 : vector<1x4x256xf32> to vector<4x256xf32>
    %13 = vector.broadcast %8 : f32 to vector<4x256xf32>
    %14 = arith.mulf %13, %12 : vector<4x256xf32>
    %cst = arith.constant 1.000000e+00 : f32
    %15 = arith.subf %cst, %8 : f32
    %16 = vector.broadcast %15 : f32 to vector<4x256xf32>
    %17 = arith.mulf %16, %10 : vector<4x256xf32>
    %18 = arith.addf %14, %17 : vector<4x256xf32>
    %19 = arith.subf %12, %10 : vector<4x256xf32>
    %c0_19 = arith.constant 0 : index
    %c0_20 = arith.constant 0 : index
    %c0_21 = arith.constant 0 : index
    %20 = vector.load %arg10[%c0_19, %c0_20, %c0_21] : memref<2x4x256xf32, #tpu.memory_space<vmem>>, vector<1x4x256xf32>
    %21 = vector.shape_cast %20 : vector<1x4x256xf32> to vector<4x256xf32>
    %22 = vector.shape_cast %18 : vector<4x256xf32> to vector<1x4x256xf32>
    tpu.vector_store %arg10[%c0_19, %c0_20, %c0_21], %22 {strides = array<i32>} : memref<2x4x256xf32, #tpu.memory_space<vmem>>, vector<1x4x256xf32>,
    %c0_22 = arith.constant 0 : index
    %c0_23 = arith.constant 0 : index
    %c0_24 = arith.constant 0 : index
    %23 = vector.load %arg11[%c0_22, %c0_23, %c0_24] : memref<2x4x256xf32, #tpu.memory_space<vmem>>, vector<1x4x256xf32>
    %24 = vector.shape_cast %23 : vector<1x4x256xf32> to vector<4x256xf32>
    %25 = vector.shape_cast %19 : vector<4x256xf32> to vector<1x4x256xf32>
    tpu.vector_store %arg11[%c0_22, %c0_23, %c0_24], %25 {strides = array<i32>} : memref<2x4x256xf32, #tpu.memory_space<vmem>>, vector<1x4x256xf32>,
    %26 = vector.broadcast %8 : f32 to vector<32x1xf32>
    %27 = arith.mulf %26, %6 : vector<32x1xf32>
    %28 = arith.addf %27, %7 : vector<32x1xf32>
    %29 = arith.negf %28 : vector<32x1xf32>
    %30 = math.exp %29 : vector<32x1xf32>
    %cst_25 = arith.constant 1.000000e+00 : f32
    %31 = vector.broadcast %cst_25 : f32 to vector<32x1xf32>
    %32 = arith.addf %31, %30 : vector<32x1xf32>
    %33 = arith.divf %31, %32 : vector<32x1xf32>
    %34 = arith.mulf %28, %33 : vector<32x1xf32>
    %35 = arith.addf %4, %34 : vector<32x1xf32>
    %36 = arith.truncf %18 : vector<4x256xf32> to vector<4x256xbf16>
    %cst_26 = arith.constant dense<0.000000e+00> : vector<32x256xf32>
    %37 = tpu.matmul %1, %36, %cst_26 {dimension_numbers = #tpu.dot_dimension_numbers<[1], [0], [0], [1], [0, 0, 1, 1], [], []>} : vector<32x4xbf16>, vector<4x256xbf16>, vector<32x256xf32> -> vector<32x256xf32>
    %38 = vector.broadcast %35 : vector<32x1xf32> to vector<32x256xf32>
    %39 = arith.addf %37, %38 : vector<32x256xf32>
    %40 = arith.negf %39 : vector<32x256xf32>
    %41 = math.exp %40 : vector<32x256xf32>
    %cst_27 = arith.constant 1.000000e+00 : f32
    %42 = vector.broadcast %cst_27 : f32 to vector<32x256xf32>
    %43 = arith.addf %42, %41 : vector<32x256xf32>
    %44 = arith.divf %42, %43 : vector<32x256xf32>
    %45 = arith.mulf %39, %44 : vector<32x256xf32>
    %46 = arith.truncf %45 : vector<32x256xf32> to vector<32x256xbf16>
    %cst_28 = arith.constant dense<0.000000e+00> : vector<4x256xf32>
    %47 = tpu.matmul %3, %46, %cst_28 {dimension_numbers = #tpu.dot_dimension_numbers<[1], [0], [0], [1], [0, 0, 1, 1], [], []>} : vector<4x32xbf16>, vector<32x256xbf16>, vector<4x256xf32> -> vector<4x256xf32>
    %48 = vector.broadcast %5 : vector<4x1xf32> to vector<4x256xf32>
    %49 = arith.addf %47, %48 : vector<4x256xf32>
    %50 = arith.subf %49, %19 : vector<4x256xf32>
    %51 = arith.mulf %50, %50 : vector<4x256xf32>
    %52 = vector.shape_cast %51 : vector<4x256xf32> to vector<1x4x256xf32>
    %cst_29 = arith.constant dense<0.000000e+00> : vector<1xf32>
    %53 = vector.multi_reduction <add>, %52, %cst_29 [1, 2] : vector<1x4x256xf32> to vector<1xf32>
    %54 = vector.shape_cast %53 : vector<1xf32> to vector<1x1x1xf32>
    %55 = vector.extract %54[0, 0, 0] : f32 from vector<1x1x1xf32>
    %cst_30 = arith.constant 0.000000e+00 : f32
    %56 = arith.addf %cst_30, %55 : f32
    %c1 = arith.constant 1 : index
    %c0_31 = arith.constant 0 : index
    %57 = memref.load %arg1[%c1, %c0_31] : memref<2x1xf32, #tpu.memory_space<smem>>
    %c1_32 = arith.constant 1 : index
    %c0_33 = arith.constant 0 : index
    %c0_34 = arith.constant 0 : index
    %58 = vector.load %arg2[%c1_32, %c0_33, %c0_34] : memref<2x4x256xf32, #tpu.memory_space<vmem>>, vector<1x4x256xf32>
    %59 = vector.shape_cast %58 : vector<1x4x256xf32> to vector<4x256xf32>
    %c1_35 = arith.constant 1 : index
    %c0_36 = arith.constant 0 : index
    %c0_37 = arith.constant 0 : index
    %60 = vector.load %arg3[%c1_35, %c0_36, %c0_37] : memref<2x4x256xf32, #tpu.memory_space<vmem>>, vector<1x4x256xf32>
    %61 = vector.shape_cast %60 : vector<1x4x256xf32> to vector<4x256xf32>
    %62 = vector.broadcast %57 : f32 to vector<4x256xf32>
    %63 = arith.mulf %62, %61 : vector<4x256xf32>
    %cst_38 = arith.constant 1.000000e+00 : f32
    %64 = arith.subf %cst_38, %57 : f32
    %65 = vector.broadcast %64 : f32 to vector<4x256xf32>
    %66 = arith.mulf %65, %59 : vector<4x256xf32>
    %67 = arith.addf %63, %66 : vector<4x256xf32>
    %68 = arith.subf %61, %59 : vector<4x256xf32>
    %c1_39 = arith.constant 1 : index
    %c0_40 = arith.constant 0 : index
    %c0_41 = arith.constant 0 : index
    %69 = vector.load %arg10[%c1_39, %c0_40, %c0_41] : memref<2x4x256xf32, #tpu.memory_space<vmem>>, vector<1x4x256xf32>
    %70 = vector.shape_cast %69 : vector<1x4x256xf32> to vector<4x256xf32>
    %71 = vector.shape_cast %67 : vector<4x256xf32> to vector<1x4x256xf32>
    tpu.vector_store %arg10[%c1_39, %c0_40, %c0_41], %71 {strides = array<i32>} : memref<2x4x256xf32, #tpu.memory_space<vmem>>, vector<1x4x256xf32>,
    %c1_42 = arith.constant 1 : index
    %c0_43 = arith.constant 0 : index
    %c0_44 = arith.constant 0 : index
    %72 = vector.load %arg11[%c1_42, %c0_43, %c0_44] : memref<2x4x256xf32, #tpu.memory_space<vmem>>, vector<1x4x256xf32>
    %73 = vector.shape_cast %72 : vector<1x4x256xf32> to vector<4x256xf32>
    %74 = vector.shape_cast %68 : vector<4x256xf32> to vector<1x4x256xf32>
    tpu.vector_store %arg11[%c1_42, %c0_43, %c0_44], %74 {strides = array<i32>} : memref<2x4x256xf32, #tpu.memory_space<vmem>>, vector<1x4x256xf32>,
    %75 = vector.broadcast %57 : f32 to vector<32x1xf32>
    %76 = arith.mulf %75, %6 : vector<32x1xf32>
    %77 = arith.addf %76, %7 : vector<32x1xf32>
    %78 = arith.negf %77 : vector<32x1xf32>
    %79 = math.exp %78 : vector<32x1xf32>
    %cst_45 = arith.constant 1.000000e+00 : f32
    %80 = vector.broadcast %cst_45 : f32 to vector<32x1xf32>
    %81 = arith.addf %80, %79 : vector<32x1xf32>
    %82 = arith.divf %80, %81 : vector<32x1xf32>
    %83 = arith.mulf %77, %82 : vector<32x1xf32>
    %84 = arith.addf %4, %83 : vector<32x1xf32>
    %85 = arith.truncf %67 : vector<4x256xf32> to vector<4x256xbf16>
    %cst_46 = arith.constant dense<0.000000e+00> : vector<32x256xf32>
    %86 = tpu.matmul %1, %85, %cst_46 {dimension_numbers = #tpu.dot_dimension_numbers<[1], [0], [0], [1], [0, 0, 1, 1], [], []>} : vector<32x4xbf16>, vector<4x256xbf16>, vector<32x256xf32> -> vector<32x256xf32>
    %87 = vector.broadcast %84 : vector<32x1xf32> to vector<32x256xf32>
    %88 = arith.addf %86, %87 : vector<32x256xf32>
    %89 = arith.negf %88 : vector<32x256xf32>
    %90 = math.exp %89 : vector<32x256xf32>
    %cst_47 = arith.constant 1.000000e+00 : f32
    %91 = vector.broadcast %cst_47 : f32 to vector<32x256xf32>
    %92 = arith.addf %91, %90 : vector<32x256xf32>
    %93 = arith.divf %91, %92 : vector<32x256xf32>
    %94 = arith.mulf %88, %93 : vector<32x256xf32>
    %95 = arith.truncf %94 : vector<32x256xf32> to vector<32x256xbf16>
    %cst_48 = arith.constant dense<0.000000e+00> : vector<4x256xf32>
    %96 = tpu.matmul %3, %95, %cst_48 {dimension_numbers = #tpu.dot_dimension_numbers<[1], [0], [0], [1], [0, 0, 1, 1], [], []>} : vector<4x32xbf16>, vector<32x256xbf16>, vector<4x256xf32> -> vector<4x256xf32>
    %97 = vector.broadcast %5 : vector<4x1xf32> to vector<4x256xf32>
    %98 = arith.addf %96, %97 : vector<4x256xf32>
    %99 = arith.subf %98, %68 : vector<4x256xf32>
    %100 = arith.mulf %99, %99 : vector<4x256xf32>
    %101 = vector.shape_cast %100 : vector<4x256xf32> to vector<1x4x256xf32>
    %cst_49 = arith.constant dense<0.000000e+00> : vector<1xf32>
    %102 = vector.multi_reduction <add>, %101, %cst_49 [1, 2] : vector<1x4x256xf32> to vector<1xf32>
    %103 = vector.shape_cast %102 : vector<1xf32> to vector<1x1x1xf32>
    %104 = vector.extract %103[0, 0, 0] : f32 from vector<1x1x1xf32>
    %105 = arith.addf %56, %104 : f32
    %c0_50 = arith.constant 0 : index
    %c0_51 = arith.constant 0 : index
    %106 = memref.load %arg12[%c0_50, %c0_51] : memref<1x1xf32, #tpu.memory_space<smem>>
    memref.store %105, %arg12[%c0_50, %c0_51] : memref<1x1xf32, #tpu.memory_space<smem>>
    return
  }
  func.func @transform_0(%arg0: i32) -> (i32, i32) {
    %c0_i32 = arith.constant 0 : i32
    %c0_i32_0 = arith.constant 0 : i32
    return %arg0, %c0_i32 : i32, i32
  }
  func.func @transform_1(%arg0: i32) -> (i32, i32, i32) {
    %c0_i32 = arith.constant 0 : i32
    %c0_i32_0 = arith.constant 0 : i32
    %c0_i32_1 = arith.constant 0 : i32
    return %arg0, %c0_i32, %c0_i32_0 : i32, i32, i32
  }
  func.func @transform_2(%arg0: i32) -> (i32, i32, i32) {
    %c0_i32 = arith.constant 0 : i32
    %c0_i32_0 = arith.constant 0 : i32
    %c0_i32_1 = arith.constant 0 : i32
    return %arg0, %c0_i32, %c0_i32_0 : i32, i32, i32
  }
  func.func @transform_3(%arg0: i32) -> (i32, i32) {
    %c0_i32 = arith.constant 0 : i32
    %c0_i32_0 = arith.constant 0 : i32
    %c0_i32_1 = arith.constant 0 : i32
    return %c0_i32, %c0_i32_0 : i32, i32
  }
  func.func @transform_4(%arg0: i32) -> (i32, i32) {
    %c0_i32 = arith.constant 0 : i32
    %c0_i32_0 = arith.constant 0 : i32
    %c0_i32_1 = arith.constant 0 : i32
    return %c0_i32, %c0_i32_0 : i32, i32
  }
  func.func @transform_5(%arg0: i32) -> (i32, i32) {
    %c0_i32 = arith.constant 0 : i32
    %c0_i32_0 = arith.constant 0 : i32
    %c0_i32_1 = arith.constant 0 : i32
    return %c0_i32, %c0_i32_0 : i32, i32
  }
  func.func @transform_6(%arg0: i32) -> (i32, i32) {
    %c0_i32 = arith.constant 0 : i32
    %c0_i32_0 = arith.constant 0 : i32
    %c0_i32_1 = arith.constant 0 : i32
    return %c0_i32, %c0_i32_0 : i32, i32
  }
  func.func @transform_7(%arg0: i32) -> (i32, i32) {
    %c0_i32 = arith.constant 0 : i32
    %c0_i32_0 = arith.constant 0 : i32
    %c0_i32_1 = arith.constant 0 : i32
    return %c0_i32, %c0_i32_0 : i32, i32
  }
  func.func @transform_8(%arg0: i32) -> (i32, i32) {
    %c0_i32 = arith.constant 0 : i32
    %c0_i32_0 = arith.constant 0 : i32
    %c0_i32_1 = arith.constant 0 : i32
    return %c0_i32, %c0_i32_0 : i32, i32
  }
  func.func @transform_9(%arg0: i32) -> (i32, i32, i32) {
    %c0_i32 = arith.constant 0 : i32
    %c0_i32_0 = arith.constant 0 : i32
    %c0_i32_1 = arith.constant 0 : i32
    return %arg0, %c0_i32, %c0_i32_0 : i32, i32, i32
  }
  func.func @transform_10(%arg0: i32) -> (i32, i32, i32) {
    %c0_i32 = arith.constant 0 : i32
    %c0_i32_0 = arith.constant 0 : i32
    %c0_i32_1 = arith.constant 0 : i32
    return %arg0, %c0_i32, %c0_i32_0 : i32, i32, i32
  }
  func.func @transform_11(%arg0: i32) -> (i32, i32) {
    %c0_i32 = arith.constant 0 : i32
    %c0_i32_0 = arith.constant 0 : i32
    return %arg0, %c0_i32 : i32, i32
  }
}

</mosaic_0001>

<bundles_post_ra>
// kernel: tpu_custom_call.1
= control target key start
LH: loop header
LB: loop body
LE: loop exit
PB: predicated region body
PF: predicated region fallthrough
CT: control target
= control target key end

     0   :  { %17 = vsyncpa [#allocation5], 0  ;;  %s2015_s0 = inlined_call_operand.vmem [shape: f32[2,1], index: 0, kind: input, shape index: {}]   ;;  %s2016_s1 = inlined_call_operand.vmem [shape: f32[2,4,256], index: 1, kind: input, shape index: {}]   ;;  %s2017_s2 = inlined_call_operand.vmem [shape: f32[2,4,256], index: 2, kind: input, shape index: {}]   ;;  %s2018_s3 = inlined_call_operand.vmem [shape: f32[32,4], index: 3, kind: input, shape index: {}]   ;;  %s2019_s4 = inlined_call_operand.vmem [shape: f32[32,1], index: 4, kind: input, shape index: {}]   ;;  %s2020_s5 = inlined_call_operand.vmem [shape: f32[4,32], index: 5, kind: input, shape index: {}]   ;;  %s2021_s6 = inlined_call_operand.vmem [shape: f32[4,1], index: 6, kind: input, shape index: {}]   ;;  %s2022_s7 = inlined_call_operand.vmem [shape: f32[32,1], index: 7, kind: input, shape index: {}]   ;;  %s2023_s8 = inlined_call_operand.vmem [shape: f32[32,1], index: 8, kind: input, shape index: {}]   ;;  %s2024_s9 = inlined_call_operand.hbm [shape: f32[2,4,256], index: 9, kind: output, shape index: {0}]   ;;  %s2025_s10 = inlined_call_operand.hbm [shape: f32[2,4,256], index: 10, kind: output, shape index: {1}]   ;;  %s2026_s11 = inlined_call_operand.hbm [shape: f32[1,1], index: 11, kind: output, shape index: {2}]  }
   0x1   :  { %18 = vsyncpa [#allocation3], 0 }
   0x2   :  { %19 = vsyncpa [#allocation8], 0 }
   0x3   :  { %20 = vsyncpa [#allocation4], 0  ;;  %s26_s19 = sshll.u32 %s2015_s0, 4  ;;  %s1156_s20 = smov [#allocation2]   ;;  %s27_s19 = int_to_ptr.vmem [resolvable:$true] %s26_s19 }
   0x4   :  { %29 = dma.vmem_to_smem %s27_s19, 32, %s1156_s20, [#allocation5]  }
   0x5   :  { %1148 = dma.done.wait [#allocation5], 32  }
   0x6   :  { %1149 = vsyncadd [#allocation5], 4294967264 }
   0x7   :  { %50 = sfence }
   0x8   :  { %s73_s21 = sld [smem:[#allocation2]]  ;;  %v74_v0 = vld [vmem:[%s2016_s1] sm:$0xff]  ;;  %v946_v3 = vld [vmem:[%s2016_s1 + $0x8] sm:$0xff]  ;;  %v1157_v6 = vmov 0   ;;  %v1249_v7 = vld [vmem:[%s2022_s7 + $0x10] sm:$0xff]  ;;  %vm2028_vm0 = vcmask 1041408  }
   0x9   :  { %v75_v1 = vld [vmem:[%s2017_s2] sm:$0xff]  ;;  %s1234_s26 = sld [smem:[#allocation2 + $0x80]]  ;;  %v947_v4 = vld [vmem:[%s2017_s2 + $0x8] sm:$0xff]  ;;  %978 = vset.pattern.permute.xlu1 %v1157_v6  ;;  %977 = vset.pattern.permute.xlu0 %v1157_v6  ;;  %v1257_v9 = vld [vmem:[%s2022_s7 + $0x18] sm:$0xff]  ;;  %vm2027_vm1 = vcmask 31744   ;;  %s881_s22 = sshll.u32 %s2024_s9, 4  ;;  %s882_s22 = int_to_ptr.hbm [resolvable:$true] %s881_s22 }
   0xa   :  { %v1232_v2 = vsub.f32 %v75_v1, %v74_v0  ;;  %v1242_v5 = vsub.f32 %v947_v4, %v946_v3  ;;  %v65_v8 = vld [vmem:[%s2022_s7] sm:$0xff]  ;;  %979 = vset.pattern.permute.xlu2 %v1157_v6  ;;  %v1262_v11 = vld [vmem:[%s2023_s8 + $0x10] sm:$0xff]  ;;  %v1275_v17 = vld [vmem:[%s2023_s8 + $0x18] sm:$0xff]  ;;  %s1158_s23 = smov [#allocation6]   ;;  %s1159_s24 = smov 128  }
   0xb   :  { %v69_v12 = vld [vmem:[%s2023_s8] sm:$0xff]  ;;  %v66_v18 = vld [vmem:[%s2022_s7 + $0x8] sm:$0xff]  ;;  %v54_v61 = vld [vmem:[%s2018_s3 + $0x10] sm:$0xff]  ;;  %s1160_s25 = smov 8   ;;  %s894_s27 = sshll.u32 %s2025_s10, 4  ;;  %s895_s27 = int_to_ptr.hbm [resolvable:$true] %s894_s27 }
   0xc   :  { %84 = vst [vmem:[#allocation7] sm:$0xff] %v1232_v2  ;;  %v70_v27 = vld [vmem:[%s2023_s8 + $0x8] sm:$0xff]  ;;  %v52_v44 = vld [vmem:[%s2018_s3] sm:$0xff]  ;;  %v55_v62 = vld [vmem:[%s2018_s3 + $0x18] sm:$0xff]  ;;  %s906_s29 = sshll.u32 %s2026_s11, 4  ;;  %s1162_s10 = smov [#allocation9]   ;;  %s907_s29 = int_to_ptr.hbm [resolvable:$true] %s906_s29 }
   0xd   :  { %495 = vst [vmem:[#allocation7 + $0x8] sm:$0xff] %v1242_v5  ;;  %v53_v45 = vld [vmem:[%s2018_s3 + $0x8] sm:$0xff] }
   0xe   :  { %v76_v10 = vstv %s73_s21  ;;  %s78_s15 = ssub.f32 1.0, %s73_s21  ;;  %v1318_v58 = vpack.c.bf16 %v53_v45, %v52_v44  ;;  %s879_s21 = sshll.u32 %s1158_s23, 4  ;;  %s880_s21 = int_to_ptr.vmem [resolvable:$true] %s879_s21 }
   0xf   :  { %v77_v13 = vmul.f32 %v76_v10, %v75_v1  ;;  %v1268_v14 = vstv %s1234_s26  ;;  %s487_s20 = ssub.f32 1.0, %s1234_s26  ;;  %v87_v15 = vmul.f32 %v76_v10, %v1249_v7  ;;  %v85_v16 = vmul.f32 %v76_v10, %v65_v8  ;;  %s1161_s26 = smov [#allocation7]  }
  0x10   :  { %v79_v19 = vstv %s78_s15  ;;  %v486_v20 = vmul.f32 %v947_v4, %v1268_v14  ;;  %v496_v21 = vmul.f32 %v1268_v14, %v65_v8  ;;  %v88_v22 = vmul.f32 %v76_v10, %v1257_v9  ;;  %s892_s7 = sshll.u32 %s1161_s26, 4  ;;  %s893_s7 = int_to_ptr.vmem [resolvable:$true] %s892_s7 }
  0x11   :  { %v80_v23 = vmul.f32 %v79_v19, %v74_v0  ;;  %v488_v24 = vstv %s487_s20  ;;  %v1284_v25 = vadd.f32 %v87_v15, %v1262_v11  ;;  %v1286_v26 = vadd.f32 %v85_v16, %v69_v12 }
  0x12   :  { %v489_v28 = vmul.f32 %v946_v3, %v488_v24  ;;  %v1291_v29 = vadd.f32 %v496_v21, %v69_v12  ;;  %v1294_v30 = vadd.f32 %v88_v22, %v1275_v17  ;;  %v86_v31 = vmul.f32 %v76_v10, %v66_v18  ;;  %900 = dma.vmem_to_hbm [thread:$0]  %s893_s7, 256, %s895_s27, [#allocation8], %s1159_s24, %s1159_s24, %s1160_s25  }
  0x13   :  { %v81_v32 = vadd.f32 %v80_v23, %v77_v13  ;;  %v929_v33 = vmul.f32 -1.442695, %v1284_v25  ;;  %v927_v34 = vmul.f32 -1.442695, %v1286_v26  ;;  %v497_v39 = vmul.f32 %v1268_v14, %v66_v18 }
  0x14   :  { %v948_v35 = vmul.f32 -1.442695, %v1291_v29  ;;  %v1299_v36 = vadd.f32 %v86_v31, %v70_v27  ;;  %v490_v37 = vadd.f32 %v489_v28, %v486_v20  ;;  %v930_v38 = vmul.f32 -1.442695, %v1294_v30 }
  0x15   :  { %178 = vst [vmem:[#allocation1] ss:$2 sm:$0xff] %v81_v32  ;;  %980 = vpow2.f32 %v929_v33  ;;  %v1304_v41 = vadd.f32 %v497_v39, %v70_v27  ;;  %v1340_v12 = vpack.c.bf16 %v55_v62, %v54_v61 }
  0x16   :  { %83 = vst [vmem:[#allocation6] sm:$0xff] %v81_v32  ;;  %982 = vpow2.f32 %v927_v34  ;;  %v928_v40 = vmul.f32 -1.442695, %v1299_v36 }
  0x17   :  { %493 = vst [vmem:[#allocation6 + $0x8] sm:$0xff] %v490_v37  ;;  %984 = vpow2.f32 %v948_v35  ;;  %v949_v42 = vmul.f32 -1.442695, %v1304_v41 }
  0x18   :  { %986 = vpow2.f32 %v930_v38  ;;  %887 = dma.vmem_to_hbm [thread:$0]  %s880_s21, 256, %s882_s22, [#allocation3], %s1159_s24, %s1159_s24, %s1160_s25  }
  0x19   :  { %988 = vpow2.f32 %v928_v40  ;;  %v61_v40 = vld [vmem:[%s2019_s4 + $0x8] sm:$0xff] }
  0x1a   :  { %990 = vpow2.f32 %v949_v42 }
  0x1b   :  { %v981_v43 = vpop.eup %980 }
  0x1c   :  { %v983_v46 = vpop.eup %982  ;;  %v179_v47 = vld.sshfl [vmem:[#allocation1] sm:$0xff pattern:$0x75316420]  ;;  %v180_v48 = vld.sshfl [vmem:[#allocation1 + $0x8] sm:$0xff pattern:$0x75316420] }
  0x1d   :  { %v985_v49 = vpop.eup %984  ;;  %v183_v50 = vpack.c.bf16 %v179_v47, %v179_v47  ;;  %v184_v51 = vpack.c.bf16 %v180_v48, %v180_v48  ;;  %457 = vst [vmem:[#allocation1] ss:$2 sm:$0xff] %v1232_v2  ;;  %v107_v52 = vadd.f32 1.0, %v981_v43  ;;  %v105_v53 = vadd.f32 1.0, %v983_v46 }
  0x1e   :  { %v1314_v54 = vadd.f32 1.0, %v985_v49  ;;  %v987_v55 = vpop.eup %986 }
  0x1f   :  { %v214_v56 = vsel %vm2028_vm0, %v183_v50, 0  ;;  %v217_v57 = vsel %vm2028_vm0, %v184_v51, 0  ;;  %992 = vrcp.f32 %v107_v52  ;;  %v989_v59 = vpop.eup %988  ;;  %v148_v60 = vand.u32 2147483647, %v107_v52 }
  0x20   :  { %226 = vmatpush.bf16.msra.mxu0 %v214_v56  ;;  %245 = vmatpush.bf16.msra.mxu1 %v217_v57  ;;  %994 = vrcp.f32 %v105_v53  ;;  %v1331_v63 = vadd.f32 1.0, %v987_v55  ;;  %v1333_v0 = vadd.f32 1.0, %v989_v59  ;;  %v991_v1 = vpop.eup %990  ;;  %v150_v6 = vand.u32 2147483648, %v107_v52  ;;  %v60_v59 = vld [vmem:[%s2019_s4] sm:$0xff] }
  0x21   :  { %996 = vrcp.f32 %v1314_v54  ;;  %vm144_vm2 = vweird.f32 %v107_v52  ;;  %vm114_vm3 = vweird.f32 %v105_v53  ;;  %v118_v16 = vand.u32 2147483647, %v105_v53 }
  0x22   :  { %998 = vrcp.f32 %v1331_v63  ;;  %v120_v18 = vand.u32 2147483648, %v105_v53  ;;  %vm1345_vm5 = vcmp.eq.f32.partialorder %v148_v60, 8.507059e+37  ;;  %vm525_vm6 = vweird.f32 %v1314_v54 }
  0x23   :  { %931 = vmatmul.msk.bf16.vlgmr.msra.gmra.mxu0 %vm2027_vm1, %v1318_v58  ;;  %933 = vmatmul.msk.bf16.vlgmr.msra.gmra.mxu1 %vm2027_vm1, %v1318_v58  ;;  %1000 = vrcp.f32 %v1333_v0  ;;  %v151_v22 = vor.u32 1.1754944e-38, %v150_v6  ;;  %v529_v24 = vand.u32 2147483647, %v1314_v54  ;;  %v531_v31 = vand.u32 2147483648, %v1314_v54 }
  0x24   :  { %v1335_v2 = vld.sshfl [vmem:[#allocation1] sm:$0xff pattern:$0x75316420]  ;;  %v1337_v3 = vld.sshfl [vmem:[#allocation1 + $0x8] sm:$0xff pattern:$0x75316420]  ;;  %vm159_vm10 = vweird.f32 %v1331_v63  ;;  %vm129_vm12 = vweird.f32 %v1333_v0 }
  0x25   :  { %v993_v4 = vpop.eup %992  ;;  %589 = vst [vmem:[#allocation1] ss:$2 sm:$0xff] %v490_v37  ;;  %v1354_v32 = vadd.f32 1.0, %v991_v1  ;;  %vm1361_vm9 = vcmp.eq.f32.partialorder %v118_v16, 8.507059e+37  ;;  %v121_v38 = vor.u32 1.1754944e-38, %v120_v18  ;;  %v165_v44 = vand.u32 2147483648, %v1331_v63 }
  0x26   :  { %v995_v8 = vpop.eup %994  ;;  %v140_v10 = vmul.f32 %v993_v4, %v107_v52  ;;  %vm145_vm4 = vweird.f32 %v993_v4  ;;  %v163_v43 = vand.u32 2147483647, %v1331_v63  ;;  %vm1379_vm13 = vcmp.eq.f32.partialorder %v529_v24, 8.507059e+37  ;;  %v1387_v52 = vld [vmem:[%s2019_s4 + $0x10] sm:$0xff] }
  0x27   :  { %v1342_v13 = vpop.eup %996  ;;  %v110_v15 = vmul.f32 %v995_v8, %v105_v53  ;;  %vm115_vm7 = vweird.f32 %v995_v8  ;;  %vm1357_vm8 = vmor %vm144_vm2, %vm145_vm4  ;;  %1002 = vrcp.f32 %v1354_v32  ;;  %v133_v56 = vand.u32 2147483647, %v1333_v0 }
  0x28   :  { %v141_v19 = vsub.f32 1.0, %v140_v10  ;;  %v521_v21 = vmul.f32 %v1342_v13, %v1314_v54  ;;  %v999_v33 = vpop.eup %998  ;;  %vm1367_vm11 = vmor %vm114_vm3, %vm115_vm7  ;;  %vm526_vm15 = vweird.f32 %v1342_v13  ;;  %v135_v62 = vand.u32 2147483648, %v1333_v0 }
  0x29   :  { %v111_v23 = vsub.f32 1.0, %v110_v15  ;;  %v155_v42 = vmul.f32 %v999_v33, %v1331_v63  ;;  %v1001_v45 = vpop.eup %1000  ;;  %vm160_vm14 = vweird.f32 %v999_v33  ;;  %v166_v6 = vor.u32 1.1754944e-38, %v165_v44 }
  0x2a   :  { %v142_v27 = vmul.f32 %v993_v4, %v141_v19  ;;  %v522_v28 = vsub.f32 1.0, %v521_v21  ;;  %v125_v51 = vmul.f32 %v1001_v45, %v1333_v0  ;;  %vm1405_vm2 = vmor %vm159_vm10, %vm160_vm14  ;;  %vm130_vm3 = vweird.f32 %v1001_v45 }
  0x2b   :  { %v112_v35 = vmul.f32 %v995_v8, %v111_v23  ;;  %v156_v50 = vsub.f32 1.0, %v155_v42  ;;  %vm1411_vm4 = vcmp.eq.f32.partialorder %v163_v43, 8.507059e+37  ;;  %v532_v19 = vor.u32 1.1754944e-38, %v531_v31 }
  0x2c   :  { %v143_v39 = vadd.f32 %v993_v4, %v142_v27  ;;  %v523_v47 = vmul.f32 %v1342_v13, %v522_v28  ;;  %vm1427_vm7 = vcmp.eq.f32.partialorder %v133_v56, 8.507059e+37  ;;  %v136_v23 = vor.u32 1.1754944e-38, %v135_v62  ;;  %v1445_v27 = vld [vmem:[%s2019_s4 + $0x18] sm:$0xff] }
  0x2d   :  { %v113_v46 = vadd.f32 %v995_v8, %v112_v35  ;;  %v157_v61 = vmul.f32 %v999_v33, %v156_v50  ;;  %v1003_v18 = vpop.eup %1002  ;;  %v544_v0 = vand.u32 2147483647, %v1354_v32 }
  0x2e   :  { %v147_v48 = vsel %vm1357_vm8, %v993_v4, %v143_v39  ;;  %v524_v10 = vadd.f32 %v1342_v13, %v523_v47  ;;  %v536_v24 = vmul.f32 %v1003_v18, %v1354_v32  ;;  %vm540_vm8 = vweird.f32 %v1354_v32 }
  0x2f   :  { %v152_v53 = vsel %vm1345_vm5, %v151_v22, %v147_v48  ;;  %v117_v55 = vsel %vm1367_vm11, %v995_v8, %v113_v46  ;;  %v158_v15 = vadd.f32 %v999_v33, %v157_v61  ;;  %vm1419_vm5 = vmor %vm525_vm6, %vm526_vm15  ;;  %vm545_vm11 = vcmp.eq.f32.partialorder %v544_v0, 8.507059e+37 }
  0x30   :  { %v171_v57 = vmul.f32 %v152_v53, %v1284_v25  ;;  %v122_v60 = vsel %vm1361_vm9, %v121_v38, %v117_v55  ;;  %v126_v25 = vsub.f32 1.0, %v125_v51  ;;  %vm1436_vm6 = vmor %vm129_vm12, %vm130_vm3  ;;  %v528_v34 = vsel %vm1419_vm5, %v1342_v13, %v524_v10 }
  0x31   :  { %v169_v1 = vmul.f32 %v122_v60, %v1286_v26  ;;  %v162_v54 = vsel %vm1405_vm2, %v999_v33, %v158_v15  ;;  %v546_v33 = vand.u32 2147483648, %v1354_v32  ;;  %v537_v37 = vsub.f32 1.0, %v536_v24 }
  0x32   :  { %v175_v8 = vadd.f32 %v171_v57, %v1387_v52  ;;  %v127_v20 = vmul.f32 %v1001_v45, %v126_v25  ;;  %v167_v28 = vsel %vm1411_vm4, %v166_v6, %v162_v54  ;;  %vm541_vm9 = vweird.f32 %v1003_v18 }
  0x33   :  { %v173_v26 = vadd.f32 %v169_v1, %v60_v59  ;;  %932 = vmatmul.msk.bf16.gmra.mxu0 %vm2027_vm1, %v1340_v12  ;;  %934 = vmatmul.msk.bf16.gmra.mxu1 %vm2027_vm1, %v1340_v12  ;;  %v172_v35 = vmul.f32 %v167_v28, %v1294_v30  ;;  %v538_v43 = vmul.f32 %v1003_v18, %v537_v37  ;;  %vm542_vm10 = vmor %vm540_vm8, %vm541_vm9  ;;  %v547_v44 = vor.u32 1.1754944e-38, %v546_v33 }
  0x34   :  { %197 = vperm.xlu0 %977, %v175_v8   ;;  %v128_v31 = vadd.f32 %v1001_v45, %v127_v20  ;;  %v533_v13 = vsel %vm1379_vm13, %v532_v19, %v528_v34 }
  0x35   :  { %187 = vperm.xlu1 %978, %v173_v26   ;;  %v176_v39 = vadd.f32 %v172_v35, %v1445_v27  ;;  %v580_v47 = vmul.f32 %v533_v13, %v1291_v29 }
  0x36   :  { %v132_v38 = vsel %vm1436_vm6, %v1001_v45, %v128_v31  ;;  %v539_v45 = vadd.f32 %v1003_v18, %v538_v43 }
  0x37   :  { %v137_v42 = vsel %vm1427_vm7, %v136_v23, %v132_v38  ;;  %v584_v53 = vadd.f32 %v580_v47, %v60_v59 }
  0x38   :  { %v170_v30 = vmul.f32 %v137_v42, %v1299_v36  ;;  %v543_v48 = vsel %vm542_vm10, %v1003_v18, %v539_v45 }
  0x39   :  { %v548_v50 = vsel %vm545_vm11, %v547_v44, %v543_v48 }
  0x3a   :  { %v174_v46 = vadd.f32 %v170_v30, %v61_v40  ;;  %v581_v51 = vmul.f32 %v548_v50, %v1304_v41 }
  0x3c   :  { %202 = vperm.xlu0 %977, %v176_v39   ;;  %v585_v49 = vadd.f32 %v581_v51, %v61_v40 }
  0x3d   :  { %192 = vperm.xlu1 %978, %v174_v46  }
  0x44   :  { %598 = vperm.xlu0 %977, %v584_v53  }
  0x45   :  { %603 = vperm.xlu1 %978, %v585_v49  }
  0xa0   :  { %v228_v36 = vpop.f32.mrf.mxu0  ;;  %v247_v55 = vpop.f32.mrf.mxu1 }
  0xa6   :  { %v198_v1 = vpop.permute.xlu0 %197 }
  0xa7   :  { %v188_v32 = vpop.permute.xlu1 %187 }
  0xa8   :  { %v1470_v56 = vadd.f32 %v228_v36, %v188_v32  ;;  %v1472_v57 = vadd.f32 %v247_v55, %v188_v32  ;;  %v230_v60 = vpop.f32.mrf.mxu0  ;;  %v249_v61 = vpop.f32.mrf.mxu1 }
  0xaa   :  { %v935_v29 = vmul.f32 -1.442695, %v1470_v56  ;;  %v936_v62 = vmul.f32 -1.442695, %v1472_v57 }
  0xac   :  { %1004 = vpow2.f32 %v935_v29 }
  0xad   :  { %1006 = vpow2.f32 %v936_v62  ;;  %v1536_v62 = vld.sshfl [vmem:[#allocation1] sm:$0xff pattern:$0x75316420] }
  0xae   :  { %v203_v54 = vpop.permute.xlu0 %202 }
  0xaf   :  { %v193_v41 = vpop.permute.xlu1 %192 }
  0xb0   :  { %v1476_v59 = vadd.f32 %v230_v60, %v193_v41  ;;  %v1478_v4 = vadd.f32 %v249_v61, %v193_v41  ;;  %v233_v6 = vpop.f32.mrf.mxu0  ;;  %v252_v25 = vpop.f32.mrf.mxu1 }
  0xb1   :  { %v1480_v8 = vadd.f32 %v233_v6, %v198_v1  ;;  %v1482_v10 = vadd.f32 %v252_v25, %v198_v1 }
  0xb2   :  { %v1005_v15 = vpop.eup %1004  ;;  %v937_v16 = vmul.f32 -1.442695, %v1476_v59  ;;  %v938_v63 = vmul.f32 -1.442695, %v1478_v4 }
  0xb3   :  { %v1007_v18 = vpop.eup %1006  ;;  %v1485_v26 = vadd.f32 1.0, %v1005_v15  ;;  %v939_v20 = vmul.f32 -1.442695, %v1480_v8  ;;  %v940_v21 = vmul.f32 -1.442695, %v1482_v10 }
  0xb4   :  { %v1488_v19 = vadd.f32 1.0, %v1007_v18  ;;  %1008 = vpow2.f32 %v937_v16  ;;  %v1543_v15 = vld.sshfl [vmem:[#allocation1 + $0x8] sm:$0xff pattern:$0x75316420] }
  0xb5   :  { %1010 = vrcp.f32 %v1485_v26  ;;  %v298_v45 = vand.u32 2147483647, %v1485_v26  ;;  %v300_v48 = vand.u32 2147483648, %v1485_v26  ;;  %vm294_vm14 = vweird.f32 %v1485_v26  ;;  %851 = vst [vmem:[#allocation1] ss:$2 sm:$0xff] %v1242_v5 }
  0xb6   :  { %1012 = vrcp.f32 %v1488_v19  ;;  %v315_v51 = vand.u32 2147483648, %v1488_v19  ;;  %v313_v55 = vand.u32 2147483647, %v1488_v19  ;;  %vm309_vm2 = vweird.f32 %v1488_v19 }
  0xb7   :  { %1014 = vpow2.f32 %v938_v63  ;;  %vm1526_vm12 = vcmp.eq.f32.partialorder %v298_v45, 8.507059e+37  ;;  %v301_v61 = vor.u32 1.1754944e-38, %v300_v48 }
  0xb8   :  { %1016 = vpow2.f32 %v939_v20  ;;  %v235_v22 = vpop.f32.mrf.mxu0  ;;  %v254_v23 = vpop.f32.mrf.mxu1  ;;  %vm1601_vm10 = vcmp.eq.f32.partialorder %v313_v55, 8.507059e+37 }
  0xb9   :  { %1018 = vpow2.f32 %v940_v21  ;;  %v1494_v24 = vadd.f32 %v235_v22, %v203_v54  ;;  %v1496_v28 = vadd.f32 %v254_v23, %v203_v54  ;;  %v1551_v21 = vor.u32 1.1754944e-38, %v315_v51 }
  0xba   :  { %v1009_v31 = vpop.eup %1008 }
  0xbb   :  { %v1498_v0 = vpop.eup %1010  ;;  %v1500_v33 = vadd.f32 1.0, %v1009_v31  ;;  %v941_v34 = vmul.f32 -1.442695, %v1494_v24  ;;  %v942_v35 = vmul.f32 -1.442695, %v1496_v28 }
  0xbc   :  { %v1504_v37 = vpop.eup %1012  ;;  %v290_v38 = vmul.f32 %v1498_v0, %v1485_v26  ;;  %vm295_vm13 = vweird.f32 %v1498_v0 }
  0xbd   :  { %v1015_v39 = vpop.eup %1014  ;;  %1020 = vrcp.f32 %v1500_v33  ;;  %v305_v13 = vmul.f32 %v1504_v37, %v1488_v19  ;;  %v330_v36 = vand.u32 2147483648, %v1500_v33  ;;  %v328_v63 = vand.u32 2147483647, %v1500_v33  ;;  %vm1561_vm15 = vmor %vm294_vm14, %vm295_vm13 }
  0xbe   :  { %v1017_v40 = vpop.eup %1016  ;;  %v1509_v42 = vadd.f32 1.0, %v1015_v39  ;;  %1022 = vpow2.f32 %v941_v34  ;;  %v291_v43 = vsub.f32 1.0, %v290_v38  ;;  %vm324_vm7 = vweird.f32 %v1500_v33 }
  0xbf   :  { %v1019_v30 = vpop.eup %1018  ;;  %v1513_v44 = vadd.f32 1.0, %v1017_v40  ;;  %1024 = vpow2.f32 %v942_v35  ;;  %v306_v50 = vsub.f32 1.0, %v305_v13  ;;  %v1565_v31 = vor.u32 1.1754944e-38, %v330_v36 }
  0xc0   :  { %1026 = vrcp.f32 %v1509_v42  ;;  %v1517_v46 = vadd.f32 1.0, %v1019_v30  ;;  %v292_v47 = vmul.f32 %v1498_v0, %v291_v43  ;;  %vm310_vm6 = vweird.f32 %v1504_v37 }
  0xc1   :  { %1028 = vrcp.f32 %v1513_v44  ;;  %v360_v6 = vand.u32 2147483648, %v1513_v44  ;;  %v307_v20 = vmul.f32 %v1504_v37, %v306_v50  ;;  %v358_v26 = vand.u32 2147483647, %v1513_v44 }
  0xc2   :  { %1030 = vrcp.f32 %v1517_v46  ;;  %v293_v60 = vadd.f32 %v1498_v0, %v292_v47  ;;  %v375_v25 = vand.u32 2147483648, %v1517_v46  ;;  %v373_v22 = vand.u32 2147483647, %v1517_v46 }
  0xc3   :  { %v1524_v53 = vpop.eup %1020  ;;  %vm354_vm3 = vweird.f32 %v1513_v44  ;;  %v361_v39 = vor.u32 1.1754944e-38, %v360_v6  ;;  %vm369_vm4 = vweird.f32 %v1517_v46  ;;  %v308_v45 = vadd.f32 %v1504_v37, %v307_v20 }
  0xc4   :  { %v1023_v32 = vpop.eup %1022  ;;  %v320_v29 = vmul.f32 %v1524_v53, %v1500_v33  ;;  %v297_v35 = vsel %vm1561_vm15, %v1498_v0, %v293_v60  ;;  %v1580_v43 = vor.u32 1.1754944e-38, %v375_v25  ;;  %vm325_vm5 = vweird.f32 %v1524_v53  ;;  %vm1633_vm15 = vmor %vm309_vm2, %vm310_vm6 }
  0xc5   :  { %v1025_v1 = vpop.eup %1024  ;;  %v1538_v41 = vadd.f32 1.0, %v1023_v32  ;;  %v1590_v48 = vsel %vm1526_vm12, %v301_v61, %v297_v35  ;;  %vm1595_vm8 = vcmp.eq.f32.partialorder %v358_v26, 8.507059e+37  ;;  %vm1608_vm13 = vcmp.eq.f32.partialorder %v373_v22, 8.507059e+37 }
  0xc6   :  { %v1545_v16 = vpop.eup %1026  ;;  %v1547_v18 = vadd.f32 1.0, %v1025_v1  ;;  %v321_v38 = vsub.f32 1.0, %v320_v29  ;;  %vm1620_vm1 = vcmp.eq.f32.partialorder %v328_v63, 8.507059e+37  ;;  %v312_v19 = vsel %vm1633_vm15, %v1504_v37, %v308_v45 }
  0xc7   :  { %v1554_v54 = vpop.eup %1028  ;;  %1032 = vrcp.f32 %v1538_v41  ;;  %v388_v30 = vand.u32 2147483647, %v1538_v41  ;;  %v390_v0 = vand.u32 2147483648, %v1538_v41  ;;  %v335_v50 = vmul.f32 %v1545_v16, %v1509_v42 }
  0xc8   :  { %v1568_v34 = vpop.eup %1030  ;;  %1034 = vrcp.f32 %v1547_v18  ;;  %v350_v5 = vmul.f32 %v1554_v54, %v1513_v44  ;;  %v322_v32 = vmul.f32 %v1524_v53, %v321_v38  ;;  %vm355_vm12 = vweird.f32 %v1554_v54 }
  0xc9   :  { %v365_v40 = vmul.f32 %v1568_v34, %v1517_v46  ;;  %v403_v1 = vand.u32 2147483647, %v1547_v18  ;;  %v336_v6 = vsub.f32 1.0, %v335_v50  ;;  %vm1615_vm14 = vcmp.eq.f32.partialorder %v388_v30, 8.507059e+37  ;;  %vm1642_vm9 = vmor %vm354_vm3, %vm355_vm12 }
  0xca   :  { %v351_v13 = vsub.f32 1.0, %v350_v5  ;;  %v391_v22 = vor.u32 1.1754944e-38, %v390_v0  ;;  %vm370_vm0 = vweird.f32 %v1568_v34  ;;  %vm340_vm2 = vweird.f32 %v1545_v16 }
  0xcb   :  { %v366_v47 = vsub.f32 1.0, %v365_v40  ;;  %v405_v40 = vand.u32 2147483648, %v1547_v18  ;;  %v337_v30 = vmul.f32 %v1545_v16, %v336_v6  ;;  %vm1646_vm11 = vcmp.eq.f32.partialorder %v403_v1, 8.507059e+37  ;;  %vm1661_vm6 = vmor %vm369_vm4, %vm370_vm0 }
  0xcc   :  { %v352_v51 = vmul.f32 %v1554_v54, %v351_v13  ;;  %v323_v13 = vadd.f32 %v1524_v53, %v322_v32  ;;  %vm2075_vm0 = vweird.f32 %v1509_v42  ;;  %v345_v33 = vand.u32 2147483648, %v1509_v42 }
  0xcd   :  { %v1033_v49 = vpop.eup %1032  ;;  %v367_v61 = vmul.f32 %v1568_v34, %v366_v47  ;;  %v338_v46 = vadd.f32 %v1545_v16, %v337_v30  ;;  %v406_v6 = vor.u32 1.1754944e-38, %v405_v40  ;;  %vm1683_vm4 = vmor %vm2075_vm0, %vm340_vm2 }
  0xce   :  { %v1035_v25 = vpop.eup %1034  ;;  %v353_v55 = vadd.f32 %v1554_v54, %v352_v51  ;;  %v380_v20 = vmul.f32 %v1033_v49, %v1538_v41  ;;  %vm385_vm3 = vweird.f32 %v1033_v49 }
  0xcf   :  { %v368_v5 = vadd.f32 %v1568_v34, %v367_v61  ;;  %v395_v35 = vmul.f32 %v1035_v25, %v1547_v18  ;;  %vm400_vm12 = vweird.f32 %v1035_v25  ;;  %v343_v61 = vand.u32 2147483647, %v1509_v42 }
  0xd0   :  { %v381_v38 = vsub.f32 1.0, %v380_v20  ;;  %v357_v51 = vsel %vm1642_vm9, %v1554_v54, %v353_v55  ;;  %vm1672_vm9 = vmor %vm324_vm7, %vm325_vm5  ;;  %vm2078_vm5 = vweird.f32 %v1538_v41  ;;  %v346_v41 = vor.u32 1.1754944e-38, %v345_v33 }
  0xd1   :  { %v396_v47 = vsub.f32 1.0, %v395_v35  ;;  %v372_v37 = vsel %vm1661_vm6, %v1568_v34, %v368_v5  ;;  %v327_v55 = vsel %vm1672_vm9, %v1524_v53, %v323_v13  ;;  %v362_v20 = vsel %vm1595_vm8, %v361_v39, %v357_v51  ;;  %vm386_vm7 = vmor %vm2078_vm5, %vm385_vm3 }
  0xd2   :  { %v382_v44 = vmul.f32 %v1033_v49, %v381_v38  ;;  %v317_v35 = vsel %vm1601_vm10, %v1551_v21, %v312_v19  ;;  %v342_v53 = vsel %vm1683_vm4, %v1545_v16, %v338_v46  ;;  %v377_v42 = vsel %vm1608_vm13, %v1580_v43, %v372_v37 }
  0xd3   :  { %v397_v45 = vmul.f32 %v1035_v25, %v396_v47  ;;  %vm2079_vm8 = vweird.f32 %v1547_v18  ;;  %v498_v39 = vmul.f32 %v1268_v14, %v1249_v7  ;;  %v332_v16 = vsel %vm1620_vm1, %v1565_v31, %v327_v55 }
  0xd4   :  { %v383_v1 = vadd.f32 %v1033_v49, %v382_v44  ;;  %vm401_vm15 = vmor %vm2079_vm8, %vm400_vm12  ;;  %vm344_vm10 = vcmp.eq.f32.partialorder %v343_v61, 8.507059e+37  ;;  %v413_v60 = vmul.f32 %v362_v20, %v1480_v8  ;;  %v414_v29 = vmul.f32 %v377_v42, %v1482_v10 }
  0xd5   :  { %v398_v5 = vadd.f32 %v1035_v25, %v397_v45  ;;  %v1718_v26 = vadd.f32 %v498_v39, %v1262_v11  ;;  %v411_v23 = vmul.f32 %v332_v16, %v1476_v59  ;;  %v594_v8 = vpack.c.bf16 %v1536_v62, %v1536_v62 }
  0xd6   :  { %v387_v38 = vsel %vm386_vm7, %v1033_v49, %v383_v1  ;;  %v347_v49 = vsel %vm344_vm10, %v346_v41, %v342_v53  ;;  %v410_v59 = vmul.f32 %v317_v35, %v1472_v57  ;;  %vm2080_vm1 = vcmask 1041408  }
  0xd7   :  { %v392_v21 = vsel %vm1615_vm14, %v391_v22, %v387_v38  ;;  %v402_v36 = vsel %vm401_vm15, %v1035_v25, %v398_v5  ;;  %v499_v25 = vmul.f32 %v1268_v14, %v1257_v9  ;;  %v412_v10 = vmul.f32 %v347_v49, %v1478_v4  ;;  %v58_v14 = vld [vmem:[%s2020_s5] sm:$0xf] }
  0xd8   :  { %v415_v43 = vmul.f32 %v392_v21, %v1494_v24  ;;  %v407_v18 = vsel %vm1646_vm11, %v406_v6, %v402_v36  ;;  %v595_v24 = vpack.c.bf16 %v1543_v15, %v1543_v15  ;;  %v409_v9 = vmul.f32 %v1590_v48, %v1470_v56  ;;  %vm2081_vm11 = vmmov %vm2080_vm1 }
  0xd9   :  { %v416_v7 = vmul.f32 %v407_v18, %v1496_v28  ;;  %v950_v28 = vmul.f32 -1.442695, %v1718_v26  ;;  %v503_v11 = vadd.f32 %v499_v25, %v1275_v17  ;;  %v617_v4 = vsel %vm2080_vm1, %v594_v8, 0 }
  0xda   :  { %v419_v31 = vpack.c.bf16 %v415_v43, %v413_v60  ;;  %v417_v15 = vpack.c.bf16 %v411_v23, %v409_v9  ;;  %v418_v40 = vpack.c.bf16 %v412_v10, %v410_v59  ;;  %v1737_v13 = vpack.c.bf16 %v58_v14, %v58_v14  ;;  %v599_v23 = vpop.permute.xlu0 %598 }
  0xdb   :  { %v420_v22 = vpack.c.bf16 %v416_v7, %v414_v29  ;;  %1036 = vpow2.f32 %v950_v28  ;;  %v951_v62 = vmul.f32 -1.442695, %v503_v11  ;;  %v620_v17 = vsel %vm2081_vm11, %v595_v24, 0 }
  0xdc   :  { %436 = vmatpush.bf16.msra.mxu2 %v419_v31  ;;  %vm2030_vm13 = vcmask 261120   ;;  %vm2082_vm9 = vcmask 31744   ;;  %vm2029_vm10 = vcmask 1043456  }
  0xdd   :  { %449 = vmatpush.bf16.msra.mxu3 %v420_v22  ;;  %1038 = vpow2.f32 %v951_v62  ;;  %vm2083_vm4 = vmmov %vm2082_vm9 }
  0xde   :  { %vm2084_vm8 = vmmov %vm2083_vm4 }
  0xdf   :  { %vm2085_vm15 = vmmov %vm2083_vm4 }
  0xe0   :  { %437 = vmatpush.bf16.msra.mxu2 %v417_v15 }
  0xe1   :  { %450 = vmatpush.bf16.msra.mxu3 %v418_v40  ;;  %v1037_v56 = vpop.eup %1036 }
  0xe2   :  { %v518_v57 = vadd.f32 1.0, %v1037_v56 }
  0xe3   :  { %943 = vmatmul.msk.bf16.vlgmr.msra.gmra.mxu2 %vm2030_vm13, %v1737_v13  ;;  %v1039_v48 = vpop.eup %1038 }
  0xe4   :  { %629 = vmatpush.bf16.msrb.mxu2 %v617_v4  ;;  %944 = vmatmul.msk.bf16.vlgmr.msra.gmra.mxu3 %vm2030_vm13, %v1737_v13  ;;  %1040 = vrcp.f32 %v518_v57  ;;  %v519_v63 = vadd.f32 1.0, %v1039_v48  ;;  %v561_v47 = vand.u32 2147483648, %v518_v57  ;;  %vm555_vm14 = vweird.f32 %v518_v57 }
  0xe5   :  { %648 = vmatpush.bf16.msrb.mxu3 %v620_v17  ;;  %v559_v51 = vand.u32 2147483647, %v518_v57 }
  0xe6   :  { %1042 = vrcp.f32 %v519_v63  ;;  %v562_v37 = vor.u32 1.1754944e-38, %v561_v47  ;;  %v576_v45 = vand.u32 2147483648, %v519_v63  ;;  %vm570_vm6 = vweird.f32 %v519_v63 }
  0xe7   :  { %v574_v46 = vand.u32 2147483647, %v519_v63  ;;  %vm560_vm0 = vcmp.eq.f32.partialorder %v559_v51, 8.507059e+37 }
  0xe8   :  { %v577_v55 = vor.u32 1.1754944e-38, %v576_v45 }
  0xe9   :  { %vm575_vm7 = vcmp.eq.f32.partialorder %v574_v46, 8.507059e+37 }
  0xea   :  { %v1041_v30 = vpop.eup %1040 }
  0xeb   :  { %v551_v0 = vmul.f32 %v1041_v30, %v518_v57  ;;  %vm556_vm2 = vweird.f32 %v1041_v30 }
  0xec   :  { %v1043_v50 = vpop.eup %1042  ;;  %vm557_vm3 = vmor %vm555_vm14, %vm556_vm2 }
  0xed   :  { %v552_v19 = vsub.f32 1.0, %v551_v0  ;;  %v566_v44 = vmul.f32 %v1043_v50, %v519_v63  ;;  %vm571_vm12 = vweird.f32 %v1043_v50 }
  0xee   :  { %vm572_vm5 = vmor %vm570_vm6, %vm571_vm12 }
  0xef   :  { %v553_v32 = vmul.f32 %v1041_v30, %v552_v19  ;;  %v567_v54 = vsub.f32 1.0, %v566_v44 }
  0xf1   :  { %v554_v61 = vadd.f32 %v1041_v30, %v553_v32  ;;  %v568_v1 = vmul.f32 %v1043_v50, %v567_v54 }
  0xf3   :  { %952 = vmatmul.msk.bf16.vlgmr.msrb.gmra.mxu2 %vm2082_vm9, %v1318_v58  ;;  %v558_v6 = vsel %vm557_vm3, %v1041_v30, %v554_v61  ;;  %v569_v33 = vadd.f32 %v1043_v50, %v568_v1 }
  0xf4   :  { %954 = vmatmul.msk.bf16.vlgmr.msrb.gmra.mxu3 %vm2083_vm4, %v1318_v58  ;;  %v563_v34 = vsel %vm560_vm0, %v562_v37, %v558_v6  ;;  %v64_v58 = vld [vmem:[%s2021_s6] sm:$0xf] }
  0xf5   :  { %v582_v20 = vmul.f32 %v563_v34, %v1718_v26  ;;  %v573_v5 = vsel %vm572_vm5, %v1043_v50, %v569_v33 }
  0xf6   :  { %v578_v53 = vsel %vm575_vm7, %v577_v55, %v573_v5 }
  0xf7   :  { %v586_v35 = vadd.f32 %v582_v20, %v1387_v52  ;;  %v583_v38 = vmul.f32 %v578_v53, %v503_v11 }
  0xf9   :  { %608 = vperm.xlu2 %979, %v586_v35   ;;  %v587_v42 = vadd.f32 %v583_v38, %v1445_v27 }
 0x101   :  { %613 = vperm.xlu2 %979, %v587_v42  }
 0x103   :  { %953 = vmatmul.msk.bf16.gmra.mxu2 %vm2084_vm8, %v1340_v12 }
 0x104   :  { %955 = vmatmul.msk.bf16.gmra.mxu3 %vm2085_vm15, %v1340_v12 }
 0x109   :  { %423 = vperm.xlu2 %979, %v64_v58  }
 0x153   :  { %v609_v41 = vpop.permute.xlu2 %608 }
 0x15b   :  { %v1758_v39 = vpop.permute.xlu2 %613 }
 0x163   :  { %v1760_v52 = vpop.permute.xlu2 %423 }
 0x166   :  { %v439_v21 = vpop.f32.mrf.mxu2 }
 0x167   :  { %v440_v27 = vadd.f32 %v439_v21, %v1760_v52  ;;  %v452_v36 = vpop.f32.mrf.mxu3 }
 0x168   :  { %v453_v16 = vadd.f32 %v452_v36, %v1760_v52 }
 0x169   :  { %v462_v60 = vsub.f32 %v440_v27, %v1335_v2 }
 0x16a   :  { %v463_v12 = vsub.f32 %v453_v16, %v1337_v3  ;;  %v604_v3 = vpop.permute.xlu1 %603 }
 0x16b   :  { %v464_v43 = vmul.f32 %v462_v60, %v462_v60 }
 0x16c   :  { %v465_v18 = vmul.f32 %v463_v12, %v463_v12 }
 0x16d   :  { %v467_v49 = vsel %vm2029_vm10, %v464_v43, 0.0 }
 0x16e   :  { %v441_v29 = vpop.f32.mrf.mxu2  ;;  %v468_v7 = vsel %vm2029_vm10, %v465_v18, 0.0 }
 0x16f   :  { %v454_v26 = vpop.f32.mrf.mxu3  ;;  %v469_v25 = vadd.f32 %v468_v7, %v467_v49 }
 0x171   :  { %470 = vadd.xlane.f32.xlu0 %v469_v25 }
 0x176   :  { %v631_v31 = vpop.f32.mrf.mxu2 }
 0x177   :  { %v650_v8 = vpop.f32.mrf.mxu3  ;;  %v1768_v24 = vadd.f32 %v631_v31, %v599_v23 }
 0x178   :  { %v1770_v22 = vadd.f32 %v650_v8, %v599_v23 }
 0x179   :  { %v956_v2 = vmul.f32 -1.442695, %v1768_v24 }
 0x17a   :  { %v957_v28 = vmul.f32 -1.442695, %v1770_v22 }
 0x17b   :  { %1044 = vpow2.f32 %v956_v2 }
 0x17c   :  { %1046 = vpow2.f32 %v957_v28 }
 0x17e   :  { %v633_v10 = vpop.f32.mrf.mxu2 }
 0x17f   :  { %v1774_v11 = vadd.f32 %v633_v10, %v604_v3  ;;  %v652_v9 = vpop.f32.mrf.mxu3 }
 0x180   :  { %v1776_v14 = vadd.f32 %v652_v9, %v604_v3 }
 0x181   :  { %v958_v59 = vmul.f32 -1.442695, %v1774_v11  ;;  %v1045_v15 = vpop.eup %1044 }
 0x182   :  { %v959_v62 = vmul.f32 -1.442695, %v1776_v14  ;;  %v1047_v57 = vpop.eup %1046  ;;  %v1784_v48 = vadd.f32 1.0, %v1045_v15 }
 0x183   :  { %1048 = vpow2.f32 %v958_v59  ;;  %v1788_v47 = vadd.f32 1.0, %v1047_v57 }
 0x184   :  { %1050 = vpow2.f32 %v959_v62  ;;  %vm697_vm1 = vweird.f32 %v1784_v48  ;;  %v701_v12 = vand.u32 2147483647, %v1784_v48  ;;  %v703_v43 = vand.u32 2147483648, %v1784_v48 }
 0x185   :  { %v716_v31 = vand.u32 2147483647, %v1788_v47  ;;  %v718_v23 = vand.u32 2147483648, %v1788_v47  ;;  %vm712_vm5 = vweird.f32 %v1788_v47 }
 0x186   :  { %v636_v4 = vpop.f32.mrf.mxu2  ;;  %v1855_v28 = vor.u32 1.1754944e-38, %v703_v43  ;;  %vm1898_vm8 = vcmp.eq.f32.partialorder %v701_v12, 8.507059e+37 }
 0x187   :  { %v1780_v40 = vadd.f32 %v636_v4, %v609_v41  ;;  %v655_v17 = vpop.f32.mrf.mxu3 }
 0x188   :  { %v1782_v56 = vadd.f32 %v655_v17, %v609_v41 }
 0x189   :  { %v960_v63 = vmul.f32 -1.442695, %v1780_v40  ;;  %v1049_v0 = vpop.eup %1048 }
 0x18a   :  { %v961_v30 = vmul.f32 -1.442695, %v1782_v56  ;;  %v1051_v19 = vpop.eup %1050  ;;  %v1791_v51 = vadd.f32 1.0, %v1049_v0 }
 0x18b   :  { %1052 = vpow2.f32 %v960_v63  ;;  %v1797_v45 = vadd.f32 1.0, %v1051_v19 }
 0x18c   :  { %1054 = vrcp.f32 %v1784_v48  ;;  %v733_v18 = vand.u32 2147483648, %v1791_v51  ;;  %vm727_vm14 = vweird.f32 %v1791_v51  ;;  %v731_v9 = vand.u32 2147483647, %v1791_v51 }
 0x18d   :  { %1056 = vpow2.f32 %v961_v30  ;;  %v748_v2 = vand.u32 2147483648, %v1797_v45  ;;  %v746_v63 = vand.u32 2147483647, %v1797_v45  ;;  %vm742_vm6 = vweird.f32 %v1797_v45 }
 0x18e   :  { %v638_v50 = vpop.f32.mrf.mxu2  ;;  %1058 = vrcp.f32 %v1788_v47  ;;  %v734_v15 = vor.u32 1.1754944e-38, %v733_v18  ;;  %vm1886_vm0 = vcmp.eq.f32.partialorder %v731_v9, 8.507059e+37 }
 0x18f   :  { %v1795_v32 = vadd.f32 %v638_v50, %v1758_v39  ;;  %v657_v37 = vpop.f32.mrf.mxu3  ;;  %1060 = vrcp.f32 %v1791_v51 }
 0x190   :  { %v1807_v6 = vadd.f32 %v657_v37, %v1758_v39 }
 0x191   :  { %v1053_v44 = vpop.eup %1052  ;;  %v962_v61 = vmul.f32 -1.442695, %v1795_v32 }
 0x192   :  { %v1799_v54 = vadd.f32 1.0, %v1053_v44  ;;  %v1801_v46 = vpop.eup %1054  ;;  %v963_v20 = vmul.f32 -1.442695, %v1807_v6 }
 0x193   :  { %v1057_v1 = vpop.eup %1056  ;;  %v693_v34 = vmul.f32 %v1801_v46, %v1784_v48  ;;  %vm698_vm11 = vweird.f32 %v1801_v46  ;;  %v1881_v48 = vor.u32 1.1754944e-38, %v748_v2 }
 0x194   :  { %1062 = vrcp.f32 %v1799_v54  ;;  %v1809_v55 = vpop.eup %1058  ;;  %v1814_v33 = vadd.f32 1.0, %v1057_v1  ;;  %vm1865_vm2 = vmor %vm697_vm1, %vm698_vm11  ;;  %v761_v30 = vand.u32 2147483647, %v1799_v54  ;;  %v763_v0 = vand.u32 2147483648, %v1799_v54 }
 0x195   :  { %1064 = vrcp.f32 %v1797_v45  ;;  %v1817_v5 = vpop.eup %1060  ;;  %v708_v35 = vmul.f32 %v1809_v55, %v1788_v47  ;;  %v694_v38 = vsub.f32 1.0, %v693_v34  ;;  %vm713_vm3 = vweird.f32 %v1809_v55 }
 0x196   :  { %1066 = vpow2.f32 %v962_v61  ;;  %v723_v41 = vmul.f32 %v1817_v5, %v1791_v51  ;;  %vm728_vm9 = vweird.f32 %v1817_v5  ;;  %vm757_vm4 = vweird.f32 %v1799_v54 }
 0x197   :  { %1068 = vrcp.f32 %v1814_v33  ;;  %v709_v21 = vsub.f32 1.0, %v708_v35  ;;  %v695_v27 = vmul.f32 %v1801_v46, %v694_v38  ;;  %vm1906_vm1 = vcmp.eq.f32.partialorder %v761_v30, 8.507059e+37 }
 0x198   :  { %1070 = vpow2.f32 %v963_v20  ;;  %v724_v29 = vsub.f32 1.0, %v723_v41  ;;  %v776_v20 = vand.u32 2147483647, %v1814_v33  ;;  %vm772_vm11 = vweird.f32 %v1814_v33 }
 0x199   :  { %v710_v25 = vmul.f32 %v1809_v55, %v709_v21  ;;  %v1849_v8 = vadd.f32 %v1801_v46, %v695_v27 }
 0x19a   :  { %v1822_v53 = vpop.eup %1062  ;;  %v725_v62 = vmul.f32 %v1817_v5, %v724_v29 }
 0x19b   :  { %v753_v42 = vmul.f32 %v1822_v53, %v1799_v54  ;;  %v1826_v58 = vpop.eup %1064  ;;  %v1870_v57 = vadd.f32 %v1809_v55, %v710_v25  ;;  %v700_v19 = vsel %vm1865_vm2, %v1801_v46, %v1849_v8  ;;  %vm758_vm12 = vweird.f32 %v1822_v53 }
 0x19c   :  { %v1067_v39 = vpop.eup %1066  ;;  %v738_v7 = vmul.f32 %v1826_v58, %v1797_v45  ;;  %v726_v1 = vadd.f32 %v1817_v5, %v725_v62  ;;  %vm743_vm7 = vweird.f32 %v1826_v58  ;;  %vm1902_vm15 = vmor %vm757_vm4, %vm758_vm12  ;;  %vm1925_vm4 = vcmp.eq.f32.partialorder %v746_v63, 8.507059e+37 }
 0x19d   :  { %v754_v36 = vsub.f32 1.0, %v753_v42  ;;  %v1831_v16 = vadd.f32 1.0, %v1067_v39  ;;  %v1833_v60 = vpop.eup %1068  ;;  %v764_v42 = vor.u32 1.1754944e-38, %v763_v0  ;;  %vm1921_vm12 = vmor %vm727_vm14, %vm728_vm9  ;;  %vm1935_vm14 = vcmp.eq.f32.partialorder %v776_v20, 8.507059e+37 }
 0x19e   :  { %v1071_v49 = vpop.eup %1070  ;;  %v768_v26 = vmul.f32 %v1833_v60, %v1814_v33  ;;  %v739_v4 = vsub.f32 1.0, %v738_v7  ;;  %vm773_vm2 = vweird.f32 %v1833_v60  ;;  %v730_v29 = vsel %vm1921_vm12, %v1817_v5, %v726_v1 }
 0x19f   :  { %1072 = vrcp.f32 %v1831_v16  ;;  %v755_v3 = vmul.f32 %v1822_v53, %v754_v36  ;;  %v1853_v10 = vadd.f32 1.0, %v1071_v49  ;;  %v791_v39 = vand.u32 2147483647, %v1831_v16  ;;  %vm1940_vm9 = vmor %vm772_vm11, %vm773_vm2 }
 0x1a0   :  { %v769_v59 = vsub.f32 1.0, %v768_v26  ;;  %v740_v34 = vmul.f32 %v1826_v58, %v739_v4  ;;  %v793_v36 = vand.u32 2147483648, %v1831_v16  ;;  %v778_v26 = vand.u32 2147483648, %v1814_v33  ;;  %vm1953_vm11 = vmor %vm742_vm6, %vm743_vm7 }
 0x1a1   :  { %1074 = vrcp.f32 %v1853_v10  ;;  %v756_v44 = vadd.f32 %v1822_v53, %v755_v3  ;;  %vm787_vm10 = vweird.f32 %v1831_v16  ;;  %vm792_vm13 = vcmp.eq.f32.partialorder %v791_v39, 8.507059e+37  ;;  %vm1969_vm6 = vmor %vm712_vm5, %vm713_vm3 }
 0x1a2   :  { %v770_v46 = vmul.f32 %v1833_v60, %v769_v59  ;;  %v741_v51 = vadd.f32 %v1826_v58, %v740_v34  ;;  %v794_v3 = vor.u32 1.1754944e-38, %v793_v36  ;;  %v806_v9 = vand.u32 2147483647, %v1853_v10 }
 0x1a3   :  { %v760_v27 = vsel %vm1902_vm15, %v1822_v53, %v756_v44  ;;  %v808_v59 = vand.u32 2147483648, %v1853_v10  ;;  %v735_v17 = vsel %vm1886_vm0, %v734_v15, %v730_v29  ;;  %v779_v30 = vor.u32 1.1754944e-38, %v778_v26 }
 0x1a4   :  { %v771_v53 = vadd.f32 %v1833_v60, %v770_v46  ;;  %v765_v5 = vsel %vm1906_vm1, %v764_v42, %v760_v27  ;;  %v745_v63 = vsel %vm1953_vm11, %v1826_v58, %v741_v51  ;;  %vm802_vm0 = vweird.f32 %v1853_v10 }
 0x1a5   :  { %v1073_v50 = vpop.eup %1072  ;;  %v705_v58 = vsel %vm1898_vm8, %v1855_v28, %v700_v19  ;;  %v715_v15 = vsel %vm1969_vm6, %v1809_v55, %v1870_v57  ;;  %v809_v46 = vor.u32 1.1754944e-38, %v808_v59  ;;  %vm807_vm3 = vcmp.eq.f32.partialorder %v806_v9, 8.507059e+37 }
 0x1a6   :  { %v783_v61 = vmul.f32 %v1073_v50, %v1831_v16  ;;  %vm788_vm15 = vweird.f32 %v1073_v50  ;;  %v775_v16 = vsel %vm1940_vm9, %v1833_v60, %v771_v53  ;;  %v816_v60 = vmul.f32 %v765_v5, %v1780_v40 }
 0x1a7   :  { %v1075_v21 = vpop.eup %1074  ;;  %vm789_vm12 = vmor %vm787_vm10, %vm788_vm15  ;;  %v780_v37 = vsel %vm1935_vm14, %v779_v30, %v775_v16  ;;  %v814_v40 = vmul.f32 %v735_v17, %v1774_v11  ;;  %v750_v28 = vsel %vm1925_vm4, %v1881_v48, %v745_v63  ;;  %v812_v55 = vmul.f32 %v705_v58, %v1768_v24 }
 0x1a8   :  { %v784_v41 = vsub.f32 1.0, %v783_v61  ;;  %v798_v49 = vmul.f32 %v1075_v21, %v1853_v10  ;;  %vm803_vm10 = vweird.f32 %v1075_v21  ;;  %v719_v10 = vor.u32 1.1754944e-38, %v718_v23 }
 0x1a9   :  { %vm717_vm5 = vcmp.eq.f32.partialorder %v716_v31, 8.507059e+37  ;;  %v817_v57 = vmul.f32 %v780_v37, %v1782_v56  ;;  %v815_v34 = vmul.f32 %v750_v28, %v1776_v14  ;;  %v820_v23 = vpack.c.bf16 %v814_v40, %v812_v55 }
 0x1aa   :  { %v785_v18 = vmul.f32 %v1073_v50, %v784_v41  ;;  %v799_v2 = vsub.f32 1.0, %v798_v49  ;;  %v720_v1 = vsel %vm717_vm5, %v719_v10, %v715_v15  ;;  %vm2108_vm7 = vcmask 261120  }
 0x1ab   :  { %v813_v35 = vmul.f32 %v720_v1, %v1770_v22  ;;  %vm2109_vm8 = vmmov %vm2108_vm7  ;;  %v852_v22 = vld.sshfl [vmem:[#allocation1] sm:$0xff pattern:$0x75316420]  ;;  %vm2110_vm1 = vcmask 1043456  }
 0x1ac   :  { %v786_v8 = vadd.f32 %v1073_v50, %v785_v18  ;;  %v800_v4 = vmul.f32 %v1075_v21, %v799_v2  ;;  %vm2111_vm2 = vmmov %vm2110_vm1 }
 0x1ad   :  { %v821_v48 = vpack.c.bf16 %v815_v34, %v813_v35 }
 0x1ae   :  { %v790_v62 = vsel %vm789_vm12, %v1073_v50, %v786_v8  ;;  %v801_v44 = vadd.f32 %v1075_v21, %v800_v4 }
 0x1af   :  { %v795_v45 = vsel %vm792_vm13, %v794_v3, %v790_v62  ;;  %vm804_vm13 = vmor %vm802_vm0, %vm803_vm10 }
 0x1b0   :  { %v818_v50 = vmul.f32 %v795_v45, %v1795_v32  ;;  %v805_v32 = vsel %vm804_vm13, %v1075_v21, %v801_v44  ;;  %v853_v21 = vld.sshfl [vmem:[#allocation1 + $0x8] sm:$0xff pattern:$0x75316420] }
 0x1b1   :  { %v810_v19 = vsel %vm807_vm3, %v809_v46, %v805_v32 }
 0x1b2   :  { %v822_v61 = vpack.c.bf16 %v818_v50, %v816_v60  ;;  %v819_v11 = vmul.f32 %v810_v19, %v1807_v6 }
 0x1b4   :  { %830 = vmatpush.bf16.msrb.mxu0 %v822_v61  ;;  %v823_v20 = vpack.c.bf16 %v819_v11, %v817_v57 }
 0x1b6   :  { %843 = vmatpush.bf16.msrb.mxu1 %v823_v20 }
 0x1b8   :  { %831 = vmatpush.bf16.msrb.mxu0 %v820_v23 }
 0x1ba   :  { %844 = vmatpush.bf16.msrb.mxu1 %v821_v48 }
 0x1bb   :  { %964 = vmatmul.msk.bf16.vlgmr.msrb.gmra.mxu0 %vm2108_vm7, %v1737_v13 }
 0x1bd   :  { %965 = vmatmul.msk.bf16.vlgmr.msrb.gmra.mxu1 %vm2109_vm8, %v1737_v13 }
 0x1e4   :  { %v471_v24 = vpop.xlane.xlu0 %470 }
 0x1e5   :  { %v472_v56 = vrot.slane %v471_v24, 4 }
 0x1e7   :  { %v473_v47 = vadd.f32 %v472_v56, %v471_v24 }
 0x1e9   :  { %v474_v6 = vrot.slane %v473_v47, 2 }
 0x1eb   :  { %v475_v31 = vadd.f32 %v474_v6, %v473_v47 }
 0x1ed   :  { %v476_v14 = vrot.slane %v475_v31, 1 }
 0x1ef   :  { %v477_v54 = vadd.f32 %v476_v14, %v475_v31 }
 0x1f1   :  { %966 = vpush %v477_v54 }
 0x222   :  { %s967_s30 = spop %966 }
 0x238   :  { %v833_v38 = vpop.f32.mrf.mxu0 }
 0x239   :  { %v834_v42 = vadd.f32 %v833_v38, %v1760_v52 }
 0x23a   :  { %v846_v39 = vpop.f32.mrf.mxu1 }
 0x23b   :  { %v856_v41 = vsub.f32 %v834_v42, %v852_v22  ;;  %v847_v36 = vadd.f32 %v846_v39, %v1760_v52 }
 0x23d   :  { %v858_v27 = vmul.f32 %v856_v41, %v856_v41  ;;  %v857_v12 = vsub.f32 %v847_v36, %v853_v21 }
 0x23f   :  { %v859_v43 = vmul.f32 %v857_v12, %v857_v12  ;;  %v860_v53 = vsel %vm2110_vm1, %v858_v27, 0.0 }
 0x240   :  { %v835_v13 = vpop.f32.mrf.mxu0 }
 0x241   :  { %v861_v18 = vsel %vm2111_vm2, %v859_v43, 0.0 }
 0x242   :  { %v862_v49 = vadd.f32 %v861_v18, %v860_v53  ;;  %v848_v29 = vpop.f32.mrf.mxu1 }
 0x244   :  { %863 = vadd.xlane.f32.xlu1 %v862_v49 }
 0x2b7   :  { %v864_v52 = vpop.xlane.xlu1 %863 }
 0x2b8   :  { %v865_v51 = vrot.slane %v864_v52, 4 }
 0x2ba   :  { %v866_v7 = vadd.f32 %v865_v51, %v864_v52 }
 0x2bc   :  { %v867_v26 = vrot.slane %v866_v7, 2 }
 0x2be   :  { %v868_v25 = vadd.f32 %v867_v26, %v866_v7 }
 0x2c0   :  { %v869_v8 = vrot.slane %v868_v25, 1 }
 0x2c2   :  { %v870_v2 = vadd.f32 %v869_v8, %v868_v25 }
 0x2c4   :  { %968 = vpush %v870_v2 }
 0x2f5   :  { %s969_s12 = spop %968 }
 0x2f6   :  { %s872_s3 = sadd.f32 %s969_s12, %s967_s30 }
 0x2f8   :  { %874 = sst [smem:[#allocation9]] %s872_s3 }
 0x2f9   :  { %909 = dma.smem_to_hbm %s1162_s10, 16, %s907_s29, [#allocation4]  }
 0x2fa   :  { %1150 = dma.done.wait [#allocation3], 256  }
 0x2fb   :  { %1151 = vsyncadd [#allocation3], 4294967040 }
 0x2fc   :  { %1152 = dma.done.wait [#allocation8], 256  }
 0x2fd   :  { %1153 = vsyncadd [#allocation8], 4294967040 }
 0x2fe   :  { %1154 = dma.done.wait [#allocation4], 16  }
 0x2ff   :  { %1155 = vsyncadd [#allocation4], 4294967280 }
 0x300   :  { %922 = sfence }
 0x301   :  { %923 = vsyncpa [#allocation3], 1 }
 0x302   :  { %924 = vsyncpa [#allocation8], 1 }
 0x303   :  { %925 = vsyncpa [#allocation4], 1 }
 0x304   :  { %926 = vsyncpa [#allocation5], 1 }

</bundles_post_ra>
